<compile_context>
chip_gen: v5e
topology: v5e:2x2
jax: 0.10.0
libtpu: 0.0.40
codegen_flags: <defaults>
</compile_context>

<pallas_src>
import jax
import jax.numpy as jnp
from jax.experimental import pallas as pl
from jax.experimental.pallas import tpu as pltpu


def fused_model_forward(x_nchw, conv_w, conv_b, bn_gamma, bn_beta,
                        bn_mean, bn_var, lin_w, lin_b, *,
                        eps=1e-5, batch_chunks=None, use_bf16=True):
    """Run the whole inner model. x_nchw: (N, Cin, H, W) float32 -> (N, F)."""
    N, Cin, H, W = x_nchw.shape
    Cout = conv_w.shape[0]
    F = lin_w.shape[0]
    HP, WP = H + 2, W + 2              # padded spatial dims (SAME conv, pad=1)
    WPC = WP * Cin                     # flattened (padded width, channel) axis
    WC = W * Cout                      # conv-activation lane width (128 here)
    K = 3 * WPC                        # contraction axis (3 kernel rows)
    KP = ((K + 127) // 128) * 128      # zero-padded to a lane-dense multiple of 128

    # ---- grid over batch chunks ---------------------------------------------
    # Default: ONE step.  Each extra grid step costs ~0.35 us of sequential
    # pipeline overhead; only split when the batch is big enough that each
    # chunk stays (8,*)-aligned and the "parallel" axis can be sharded across
    # v7x's two TensorCores.
    if batch_chunks is None:
        G = 2 if (N >= 16 and N % 16 == 0) else 1
    else:
        G = batch_chunks
    assert N % G == 0, "batch must divide evenly into chunks"
    NB = N // G                        # batch rows handled per grid step
    NBH = NB * H                       # LHS rows per grid step
    assert G == 1 or NB % 8 == 0, "chunked blocks must stay sublane-aligned"

    # ---- layout glue (trace-time only) --------------------------------------
    # NCHW -> NHWC, zero-pad spatially, flatten (W+2, Cin), then concatenate
    # the three dy-shifted row slabs along the contraction axis so the kernel
    # does ONE matmul.  HBM traffic is ~3x the raw input (tiny here).
    x = jnp.transpose(x_nchw, (0, 2, 3, 1)).astype(jnp.float32)       # (N,H,W,Cin)
    xp = jnp.pad(x, ((0, 0), (1, 1), (1, 1), (0, 0)))                 # (N,HP,WP,Cin)
    xp = xp.reshape(N, HP, WPC)                                       # (N,HP,WPC)
    lhs = jnp.concatenate([xp[:, dy:dy + H, :] for dy in range(3)],
                          axis=-1)                                    # (N,H,K)
    lhs = jnp.pad(lhs, ((0, 0), (0, 0), (0, KP - K))).reshape(N * H, KP)

    # ---- fold BN (eval form) into the conv weight / bias --------------------
    scale = bn_gamma / jnp.sqrt(bn_var + eps)                         # (Cout,)
    w_taps = jnp.transpose(conv_w, (2, 3, 1, 0)).astype(jnp.float32)  # (3,3,Cin,Cout)
    w_scaled = w_taps * scale[None, None, None, :]

    # Banded conv-weight expansion: bmat[dy, wp*Cin + c, w*Cout + o] =
    #   w_scaled[dy, wp - w, c, o] if 0 <= wp - w <= 2 else 0.
    wp_idx = jnp.arange(WP)
    w_idx = jnp.arange(W)
    bmat = jnp.zeros((3, WPC, WC), jnp.float32)
    for dx in range(3):
        shift = (wp_idx[:, None] == w_idx[None, :] + dx).astype(jnp.float32)
        bmat = bmat + jnp.einsum('pw,dco->dpcwo', shift,
                                 w_scaled[:, dx]).reshape(3, WPC, WC)
    wmat = jnp.pad(bmat.reshape(K, WC), ((0, KP - K), (0, 0)))        # (KP, WC)

    # Folded per-channel bias = scale*(conv_bias - running_mean) + beta,
    # tiled across W so it broadcast-adds onto the (NB*H, W*Cout) activation.
    bias_vec = scale * (conv_b - bn_mean) + bn_beta                   # (Cout,)
    bias2 = jnp.tile(bias_vec, W).reshape(1, WC).astype(jnp.float32)

    # Global-average-pool (1/(H*W)) fused into the Linear weight:
    # out = (sum_h y) @ plmat + lb, plmat[w*Cout+o, f] = lin_w[f, o] / (H*W).
    plmat = (jnp.tile(jnp.transpose(lin_w), (W, 1)) / (H * W)).astype(jnp.float32)
    lb = lin_b.reshape(1, F).astype(jnp.float32)

    # bf16 operands for the conv matmul (bf16-native MXUs); f32 accumulation.
    mm_dtype = jnp.bfloat16 if use_bf16 else jnp.float32
    lhs = lhs.astype(mm_dtype)
    wmat = wmat.astype(mm_dtype)

    # ---- Pallas kernel -------------------------------------------------------
    def kernel(x_ref, w_ref, bias2_ref, plmat_ref, lb_ref, o_ref):
        # One fat MXU matmul: (NB*H, KP) @ (KP, WC), f32 accumulation.
        acc = jnp.dot(x_ref[...], w_ref[...],
                      preferred_element_type=jnp.float32)
        # Fused BatchNorm (folded) + ReLU (VPU), lane-dense (NB*H, W*Cout).
        y = jnp.maximum(acc + bias2_ref[...], 0.0)
        # Per-batch column sum over H, kept in registers (no VMEM scratch);
        # pooling scale is folded into plmat.  H is a multiple of 8 so the
        # reshape does not cross (8,128) tile boundaries.
        ys = jnp.sum(y.reshape(NB, H, WC), axis=1)                    # (NB, WC)
        # Fused pool+Linear matmul, single lane-dense (NB, F) store.
        o_ref[...] = (jnp.dot(ys, plmat_ref[...],
                              preferred_element_type=jnp.float32)
                      + lb_ref[...]).astype(o_ref.dtype)

    out = pl.pallas_call(
        kernel,
        out_shape=jax.ShapeDtypeStruct((N, F), jnp.float32),
        grid=(G,),
        in_specs=[
            pl.BlockSpec((NBH, KP), lambda g: (g, 0)),   # im2row'd input chunk
            pl.BlockSpec((KP, WC), lambda g: (0, 0)),    # banded conv weight (BN folded)
            pl.BlockSpec((1, WC), lambda g: (0, 0)),     # folded BN bias
            pl.BlockSpec((WC, F), lambda g: (0, 0)),     # fused pool+linear weight
            pl.BlockSpec((1, F), lambda g: (0, 0)),      # linear bias
        ],
        out_specs=pl.BlockSpec((NB, F), lambda g: (g, 0)),
        compiler_params=pltpu.CompilerParams(
            dimension_semantics=("parallel",)),
    )(lhs, wmat, bias2, plmat, lb)
    return out


# Pure-JAX reference for a sanity check.
def _reference(x_nchw, conv_w, conv_b, bn_gamma, bn_beta, bn_mean, bn_var,
               lin_w, lin_b, eps=1e-5):
    conv = jax.lax.conv_general_dilated(
        x_nchw, conv_w, window_strides=(1, 1), padding="SAME",
        dimension_numbers=("NCHW", "OIHW", "NCHW"))
    conv = conv + conv_b.reshape(1, -1, 1, 1)
    y = (conv - bn_mean.reshape(1, -1, 1, 1)) / jnp.sqrt(
        bn_var.reshape(1, -1, 1, 1) + eps)
    y = y * bn_gamma.reshape(1, -1, 1, 1) + bn_beta.reshape(1, -1, 1, 1)
    y = jnp.maximum(y, 0.0)
    pooled = jnp.mean(y, axis=(2, 3))                                 # (N, Cout)
    return pooled @ lin_w.T + lin_b


if __name__ == "__main__":
    # Small shapes consistent with the module's init_weight hints
    # (Conv2d + BatchNorm2d + Linear).
    N, Cin, H, W = 2, 4, 16, 16
    Cout, F = 8, 16

    key = jax.random.PRNGKey(0)
    k_x, k_cw, k_lw = jax.random.split(key, 3)

    x = jax.random.normal(k_x, (N, Cin, H, W), dtype=jnp.float32)

    # Deterministic param init mirroring Model.init_weight:
    #   Conv2d: normal(0, sqrt(2 / (kh*kw*Cout)))
    conv_w = jax.random.normal(k_cw, (Cout, Cin, 3, 3), dtype=jnp.float32) * \
        jnp.sqrt(2.0 / (3 * 3 * Cout))
    conv_b = jnp.zeros((Cout,), dtype=jnp.float32)
    #   BatchNorm2d: weight=1, bias=0, running stats (mean=0, var=1)
    bn_gamma = jnp.ones((Cout,), dtype=jnp.float32)
    bn_beta = jnp.zeros((Cout,), dtype=jnp.float32)
    bn_mean = jnp.zeros((Cout,), dtype=jnp.float32)
    bn_var = jnp.ones((Cout,), dtype=jnp.float32)
    #   Linear: xavier_normal weight, bias=0
    xavier_std = jnp.sqrt(2.0 / (Cout + F))
    lin_w = jax.random.normal(k_lw, (F, Cout), dtype=jnp.float32) * xavier_std
    lin_b = jnp.zeros((F,), dtype=jnp.float32)

    # Default path: bf16 conv-matmul operands, f32 accumulation (loosened
    # tolerance accounts for bf16 operand rounding).
    out = fused_model_forward(x, conv_w, conv_b, bn_gamma, bn_beta,
                              bn_mean, bn_var, lin_w, lin_b)
    out = jax.block_until_ready(out)

    ref = _reference(x, conv_w, conv_b, bn_gamma, bn_beta, bn_mean, bn_var,
                     lin_w, lin_b)
    assert out.shape == (N, F)
    assert jnp.allclose(out, ref, atol=2e-2, rtol=2e-2)

    # TODO(synk): EMA.update_ema (shadow-parameter interpolation) and the
    # train/eval BN-stat toggling are training-time state management with no
    # forward-pass compute; not represented in the kernel.
    print("KERNEL_OK")
</pallas_src>

<mosaic_0001>
module attributes {stable_mosaic.version = 11 : i64} {
  func.func @kernel(%arg0: i32, %arg1: memref<32x256xbf16, #tpu.memory_space<vmem>>, %arg2: memref<256x128xbf16, #tpu.memory_space<vmem>>, %arg3: memref<1x128xf32, #tpu.memory_space<vmem>>, %arg4: memref<128x16xf32, #tpu.memory_space<vmem>>, %arg5: memref<1x16xf32, #tpu.memory_space<vmem>>, %arg6: memref<2x16xf32, #tpu.memory_space<vmem>>) attributes {dimension_semantics = [#tpu.dimension_semantics<parallel>], iteration_bounds = array<i64: 1>, scalar_prefetch = 0 : i64, scratch_operands = 0 : i64, tpu.core_type = #tpu.core_type<tc>, window_params = [{transform_indices = @transform_0, window_bounds = array<i64: 32, 256>}, {pipeline_mode = #tpu.pipeline_mode<synchronous>, transform_indices = @transform_1, window_bounds = array<i64: 256, 128>}, {pipeline_mode = #tpu.pipeline_mode<synchronous>, transform_indices = @transform_2, window_bounds = array<i64: 1, 128>}, {pipeline_mode = #tpu.pipeline_mode<synchronous>, transform_indices = @transform_3, window_bounds = array<i64: 128, 16>}, {pipeline_mode = #tpu.pipeline_mode<synchronous>, transform_indices = @transform_4, window_bounds = array<i64: 1, 16>}, {transform_indices = @transform_5, window_bounds = array<i64: 2, 16>}]} {
    %c0 = arith.constant 0 : index
    %c0_0 = arith.constant 0 : index
    %0 = vector.load %arg1[%c0, %c0_0] : memref<32x256xbf16, #tpu.memory_space<vmem>>, vector<32x256xbf16>
    %c0_1 = arith.constant 0 : index
    %c0_2 = arith.constant 0 : index
    %1 = vector.load %arg2[%c0_1, %c0_2] : memref<256x128xbf16, #tpu.memory_space<vmem>>, vector<256x128xbf16>
    %cst = arith.constant dense<0.000000e+00> : vector<32x128xf32>
    %2 = tpu.matmul %0, %1, %cst {dimension_numbers = #tpu.dot_dimension_numbers<[1], [0], [0], [1], [0, 0, 1, 1], [], []>} : vector<32x256xbf16>, vector<256x128xbf16>, vector<32x128xf32> -> vector<32x128xf32>
    %c0_3 = arith.constant 0 : index
    %c0_4 = arith.constant 0 : index
    %3 = vector.load %arg3[%c0_3, %c0_4] : memref<1x128xf32, #tpu.memory_space<vmem>>, vector<1x128xf32>
    %4 = vector.broadcast %3 : vector<1x128xf32> to vector<32x128xf32>
    %5 = arith.addf %2, %4 : vector<32x128xf32>
    %cst_5 = arith.constant 0.000000e+00 : f32
    %6 = vector.broadcast %cst_5 : f32 to vector<32x128xf32>
    %7 = arith.maximumf %5, %6 : vector<32x128xf32>
    %8 = vector.shape_cast %7 : vector<32x128xf32> to vector<2x16x128xf32>
    %cst_6 = arith.constant dense<0.000000e+00> : vector<2x128xf32>
    %9 = vector.multi_reduction <add>, %8, %cst_6 [1] : vector<2x16x128xf32> to vector<2x128xf32>
    %c0_7 = arith.constant 0 : index
    %c0_8 = arith.constant 0 : index
    %10 = vector.load %arg4[%c0_7, %c0_8] : memref<128x16xf32, #tpu.memory_space<vmem>>, vector<128x16xf32>
    %cst_9 = arith.constant dense<0.000000e+00> : vector<2x16xf32>
    %11 = tpu.matmul %9, %10, %cst_9 {dimension_numbers = #tpu.dot_dimension_numbers<[1], [0], [0], [1], [0, 0, 1, 1], [], []>} : vector<2x128xf32>, vector<128x16xf32>, vector<2x16xf32> -> vector<2x16xf32>
    %c0_10 = arith.constant 0 : index
    %c0_11 = arith.constant 0 : index
    %12 = vector.load %arg5[%c0_10, %c0_11] : memref<1x16xf32, #tpu.memory_space<vmem>>, vector<1x16xf32>
    %13 = vector.broadcast %12 : vector<1x16xf32> to vector<2x16xf32>
    %14 = arith.addf %11, %13 : vector<2x16xf32>
    %c0_12 = arith.constant 0 : index
    %c0_13 = arith.constant 0 : index
    %15 = vector.load %arg6[%c0_12, %c0_13] : memref<2x16xf32, #tpu.memory_space<vmem>>, vector<2x16xf32>
    tpu.vector_store %arg6[%c0_12, %c0_13], %14 {strides = array<i32>} : memref<2x16xf32, #tpu.memory_space<vmem>>, vector<2x16xf32>,
    return
  }
  func.func @transform_0(%arg0: i32) -> (i32, i32) {
    %c0_i32 = arith.constant 0 : i32
    %c0_i32_0 = arith.constant 0 : i32
    return %arg0, %c0_i32 : i32, i32
  }
  func.func @transform_1(%arg0: i32) -> (i32, i32) {
    %c0_i32 = arith.constant 0 : i32
    %c0_i32_0 = arith.constant 0 : i32
    %c0_i32_1 = arith.constant 0 : i32
    return %c0_i32, %c0_i32_0 : i32, i32
  }
  func.func @transform_2(%arg0: i32) -> (i32, i32) {
    %c0_i32 = arith.constant 0 : i32
    %c0_i32_0 = arith.constant 0 : i32
    %c0_i32_1 = arith.constant 0 : i32
    return %c0_i32, %c0_i32_0 : i32, i32
  }
  func.func @transform_3(%arg0: i32) -> (i32, i32) {
    %c0_i32 = arith.constant 0 : i32
    %c0_i32_0 = arith.constant 0 : i32
    %c0_i32_1 = arith.constant 0 : i32
    return %c0_i32, %c0_i32_0 : i32, i32
  }
  func.func @transform_4(%arg0: i32) -> (i32, i32) {
    %c0_i32 = arith.constant 0 : i32
    %c0_i32_0 = arith.constant 0 : i32
    %c0_i32_1 = arith.constant 0 : i32
    return %c0_i32, %c0_i32_0 : i32, i32
  }
  func.func @transform_5(%arg0: i32) -> (i32, i32) {
    %c0_i32 = arith.constant 0 : i32
    %c0_i32_0 = arith.constant 0 : i32
    return %arg0, %c0_i32 : i32, i32
  }
}

</mosaic_0001>

<bundles_post_ra>
// kernel: tpu_custom_call.1
= control target key start
LH: loop header
LB: loop body
LE: loop exit
PB: predicated region body
PF: predicated region fallthrough
CT: control target
= control target key end

     0   :  { %10 = vsyncpa [#allocation3], 0  ;;  %s621_s0 = inlined_call_operand.hbm [shape: bf16[32,256], index: 0, kind: input, shape index: {}]   ;;  %s622_s1 = inlined_call_operand.vmem [shape: bf16[256,128], index: 1, kind: input, shape index: {}]   ;;  %s623_s2 = inlined_call_operand.vmem [shape: f32[1,128], index: 2, kind: input, shape index: {}]   ;;  %s624_s3 = inlined_call_operand.vmem [shape: f32[128,16], index: 3, kind: input, shape index: {}]   ;;  %s625_s4 = inlined_call_operand.vmem [shape: f32[1,16], index: 4, kind: input, shape index: {}]   ;;  %s626_s5 = inlined_call_operand.hbm [shape: f32[2,16], index: 5, kind: output, shape index: {}]  }
   0x1   :  { %11 = vsyncpa [#allocation4], 0  ;;  %s16_s20 = sshll.u32 %s621_s0, 4  ;;  %s479_s21 = smov [#allocation2]   ;;  %s17_s20 = int_to_ptr.hbm [resolvable:$true] %s16_s20 }
   0x2   :  { %s18_s22 = sshll.u32 %s479_s21, 4  ;;  %s480_s23 = smov 128   ;;  %s19_s22 = int_to_ptr.vmem [resolvable:$true] %s18_s22 }
   0x3   :  { %s481_s24 = smov 8  }
   0x4   :  { %24 = dma.hbm_to_vmem [thread:$0]  %s17_s20, 512, %s19_s22, [#allocation3], %s480_s23, %s480_s23, %s481_s24  }
   0x5   :  { %475 = dma.done.wait [#allocation3], 512  }
   0x6   :  { %476 = vsyncadd [#allocation3], 4294966784  ;;  %v404_v0 = vld [vmem:[%s622_s1 + $0x38] sm:$0xff]  ;;  %v403_v2 = vld [vmem:[%s622_s1 + $0x30] sm:$0xff]  ;;  %vm271_vm0 = vcmask 1041409   ;;  %s482_s11 = smov [#allocation5]  }
   0x7   :  { %v412_v1 = vld [vmem:[%s622_s1 + $0x78] sm:$0xff]  ;;  %193 = vmatpush.bf16.msra.mxu0 %v404_v0  ;;  %413 = vmatpush.bf16.msra.mxu3 %v404_v0  ;;  %v411_v3 = vld [vmem:[%s622_s1 + $0x70] sm:$0xff]  ;;  %v402_v4 = vld [vmem:[%s622_s1 + $0x28] sm:$0xff]  ;;  %s301_s12 = sshll.u32 %s482_s11, 4  ;;  %s303_s15 = sshll.u32 %s626_s5, 4  ;;  %vm294_vm1 = vcmask 123904   ;;  %s302_s12 = int_to_ptr.vmem [resolvable:$true] %s301_s12  ;;  %s304_s15 = int_to_ptr.hbm [resolvable:$true] %s303_s15 }
   0x8   :  { %212 = vmatpush.bf16.msra.mxu1 %v412_v1  ;;  %v410_v5 = vld [vmem:[%s622_s1 + $0x68] sm:$0xff]  ;;  %v401_v6 = vld [vmem:[%s622_s1 + $0x20] sm:$0xff]  ;;  %v400_v8 = vld [vmem:[%s622_s1 + $0x18] sm:$0xff] }
   0x9   :  { %v409_v7 = vld [vmem:[%s622_s1 + $0x60] sm:$0xff]  ;;  %v408_v9 = vld [vmem:[%s622_s1 + $0x58] sm:$0xff]  ;;  %v399_v10 = vld [vmem:[%s622_s1 + $0x10] sm:$0xff] }
   0xa   :  { %v407_v11 = vld [vmem:[%s622_s1 + $0x50] sm:$0xff]  ;;  %v398_v12 = vld [vmem:[%s622_s1 + $0x8] sm:$0xff]  ;;  %v397_v14 = vld [vmem:[%s622_s1] sm:$0xff] }
   0xb   :  { %194 = vmatpush.bf16.msra.mxu0 %v403_v2  ;;  %414 = vmatpush.bf16.msra.mxu3 %v403_v2  ;;  %v406_v13 = vld [vmem:[%s622_s1 + $0x48] sm:$0xff]  ;;  %v315_v15 = vld [vmem:[#allocation2] sm:$0xf]  ;;  %v323_v17 = vld [vmem:[#allocation2 + $0x10] sm:$0xf] }
   0xc   :  { %213 = vmatpush.bf16.msra.mxu1 %v411_v3  ;;  %v394_v16 = vld [vmem:[#allocation2 + $0x4] sm:$0xf0]  ;;  %v396_v18 = vld [vmem:[#allocation2 + $0x14] sm:$0xf0]  ;;  %v405_v19 = vld [vmem:[%s622_s1 + $0x40] sm:$0xff] }
   0xd   :  { %v393_v20 = vld [vmem:[#allocation2 + $0x4] sm:$0xf]  ;;  %v317_v21 = vld [vmem:[#allocation2 + $0x8] sm:$0xf0]  ;;  %v316_v22 = vor.u32 %v394_v16, %v315_v15  ;;  %v324_v23 = vor.u32 %v396_v18, %v323_v17  ;;  %v395_v25 = vld [vmem:[#allocation2 + $0x14] sm:$0xf] }
   0xe   :  { %v320_v24 = vor.u32 %v393_v20, %v317_v21  ;;  %v325_v26 = vld [vmem:[#allocation2 + $0x18] sm:$0xf0]  ;;  %v263_v29 = vld [vmem:[%s624_s3 + $0x70] sm:$0xff]  ;;  %v262_v30 = vld [vmem:[%s624_s3 + $0x68] sm:$0xff] }
   0xf   :  { %195 = vmatpush.bf16.msra.mxu0 %v402_v4  ;;  %415 = vmatpush.bf16.msra.mxu3 %v402_v4  ;;  %v328_v27 = vor.u32 %v395_v25, %v325_v26  ;;  %v264_v28 = vld [vmem:[%s624_s3 + $0x78] sm:$0xff]  ;;  %v261_v31 = vld [vmem:[%s624_s3 + $0x60] sm:$0xff]  ;;  %v259_v33 = vld [vmem:[%s624_s3 + $0x50] sm:$0xff] }
  0x10   :  { %214 = vmatpush.bf16.msra.mxu1 %v410_v5  ;;  %274 = vmatpush.msra.mxu2 %v264_v28  ;;  %v260_v32 = vld [vmem:[%s624_s3 + $0x58] sm:$0xff]  ;;  %v258_v34 = vld [vmem:[%s624_s3 + $0x48] sm:$0xff]  ;;  %v257_v35 = vld [vmem:[%s624_s3 + $0x40] sm:$0xff] }
  0x11   :  { %v256_v36 = vld [vmem:[%s624_s3 + $0x38] sm:$0xff]  ;;  %v255_v37 = vld [vmem:[%s624_s3 + $0x30] sm:$0xff]  ;;  %v254_v40 = vld [vmem:[%s624_s3 + $0x28] sm:$0xff] }
  0x12   :  { %275 = vmatpush.msra.mxu2 %v263_v29  ;;  %v253_v41 = vld [vmem:[%s624_s3 + $0x20] sm:$0xff]  ;;  %v252_v43 = vld [vmem:[%s624_s3 + $0x18] sm:$0xff]  ;;  %v251_v44 = vld [vmem:[%s624_s3 + $0x10] sm:$0xff] }
  0x13   :  { %196 = vmatpush.bf16.msra.mxu0 %v401_v6  ;;  %416 = vmatpush.bf16.msra.mxu3 %v401_v6  ;;  %v425_v42 = vld [vmem:[%s623_s2] ss:$0 sm:$0xff]  ;;  %v250_v45 = vld [vmem:[%s624_s3 + $0x8] sm:$0xff] }
  0x14   :  { %215 = vmatpush.bf16.msra.mxu1 %v409_v7  ;;  %276 = vmatpush.msra.mxu2 %v262_v30  ;;  %v249_v50 = vld [vmem:[%s624_s3] sm:$0xff] }
  0x15   :  { %v426_v16 = vld [vmem:[%s625_s4] ss:$0 sm:$0xff] }
  0x16   :  { %277 = vmatpush.msra.mxu2 %v261_v31 }
  0x17   :  { %197 = vmatpush.bf16.msra.mxu0 %v400_v8  ;;  %417 = vmatpush.bf16.msra.mxu3 %v400_v8 }
  0x18   :  { %216 = vmatpush.bf16.msra.mxu1 %v408_v9  ;;  %278 = vmatpush.msra.mxu2 %v260_v32 }
  0x1a   :  { %279 = vmatpush.msra.mxu2 %v259_v33 }
  0x1b   :  { %198 = vmatpush.bf16.msra.mxu0 %v399_v10  ;;  %418 = vmatpush.bf16.msra.mxu3 %v399_v10 }
  0x1c   :  { %217 = vmatpush.bf16.msra.mxu1 %v407_v11  ;;  %280 = vmatpush.msra.mxu2 %v258_v34 }
  0x1e   :  { %281 = vmatpush.msra.mxu2 %v257_v35 }
  0x1f   :  { %199 = vmatpush.bf16.msra.mxu0 %v398_v12  ;;  %419 = vmatpush.bf16.msra.mxu3 %v398_v12 }
  0x20   :  { %218 = vmatpush.bf16.msra.mxu1 %v406_v13  ;;  %282 = vmatpush.msra.mxu2 %v256_v36 }
  0x22   :  { %283 = vmatpush.msra.mxu2 %v255_v37 }
  0x23   :  { %200 = vmatpush.bf16.msra.mxu0 %v397_v14  ;;  %420 = vmatpush.bf16.msra.mxu3 %v397_v14 }
  0x24   :  { %219 = vmatpush.bf16.msra.mxu1 %v405_v19  ;;  %284 = vmatpush.msra.mxu2 %v254_v40 }
  0x26   :  { %201 = vmatmul.bf16.vlgmr.msra.gmra.mxu0 %v316_v22  ;;  %206 = vmatmul.bf16.vlgmr.msra.gmra.mxu3 %v324_v23 }
  0x27   :  { %220 = vmatmul.bf16.vlgmr.msra.gmra.mxu1 %v320_v24  ;;  %285 = vmatpush.msra.mxu2 %v253_v41 }
  0x29   :  { %286 = vmatpush.msra.mxu2 %v252_v43 }
  0x2b   :  { %287 = vmatpush.msra.mxu2 %v251_v44 }
  0x2d   :  { %288 = vmatpush.msra.mxu2 %v250_v45 }
  0x2f   :  { %289 = vmatpush.msra.mxu2 %v249_v50 }
  0x37   :  { %225 = vmatmul.bf16.gmra.mxu1 %v328_v27 }
  0xa3   :  { %v202_v38 = vpop.f32.mrf.mxu0 }
  0xa4   :  { %v221_v39 = vpop.f32.mrf.mxu1  ;;  %v203_v46 = vadd.f32 %v425_v42, %v202_v38 }
  0xa6   :  { %v222_v53 = vadd.f32 %v221_v39, %v203_v46 }
  0xa8   :  { %v231_v55 = vmax.f32 %v222_v53, 0.0 }
  0xa9   :  { %v207_v51 = vpop.f32.mrf.mxu3 }
  0xaa   :  { %v208_v58 = vadd.f32 %v425_v42, %v207_v51 }
  0xab   :  { %v204_v47 = vpop.f32.mrf.mxu0 }
  0xac   :  { %v205_v48 = vadd.f32 %v425_v42, %v204_v47  ;;  %v223_v49 = vpop.f32.mrf.mxu1 }
  0xae   :  { %v224_v52 = vadd.f32 %v223_v49, %v205_v48 }
  0xb0   :  { %v232_v54 = vmax.f32 %v224_v52, 0.0 }
  0xb1   :  { %v209_v59 = vpop.f32.mrf.mxu3 }
  0xb2   :  { %v235_v57 = vadd.f32 %v232_v54, %v231_v55  ;;  %v210_v61 = vadd.f32 %v425_v42, %v209_v59 }
  0xb4   :  { %v226_v56 = vpop.f32.mrf.mxu1  ;;  %v236_v60 = vrot.slane %v235_v57, 4 }
  0xb5   :  { %v227_v62 = vadd.f32 %v226_v56, %v208_v58 }
  0xb6   :  { %v237_v0 = vadd.f32 %v236_v60, %v235_v57 }
  0xb7   :  { %v233_v2 = vmax.f32 %v227_v62, 0.0 }
  0xb8   :  { %v238_v4 = vrot.slane %v237_v0, 2 }
  0xba   :  { %v239_v8 = vadd.f32 %v238_v4, %v237_v0 }
  0xbc   :  { %v228_v63 = vpop.f32.mrf.mxu1  ;;  %v240_v10 = vrot.slane %v239_v8, 1 }
  0xbd   :  { %v229_v1 = vadd.f32 %v228_v63, %v210_v61 }
  0xbe   :  { %v241_v13 = vadd.f32 %v240_v10, %v239_v8 }
  0xbf   :  { %v234_v3 = vmax.f32 %v229_v1, 0.0 }
  0xc1   :  { %v242_v5 = vadd.f32 %v234_v3, %v233_v2 }
  0xc3   :  { %v243_v6 = vrot.slane %v242_v5, 4 }
  0xc5   :  { %v244_v7 = vadd.f32 %v243_v6, %v242_v5 }
  0xc7   :  { %v245_v9 = vrot.slane %v244_v7, 2 }
  0xc9   :  { %v246_v11 = vadd.f32 %v245_v9, %v244_v7 }
  0xcb   :  { %v247_v12 = vrot.slane %v246_v11, 1 }
  0xcd   :  { %v248_v14 = vadd.f32 %v247_v12, %v246_v11 }
  0xcf   :  { %v272_v15 = vsel %vm271_vm0, %v248_v14, %v241_v13 }
  0xd0   :  { %290 = vmatmul.f32.vlgmr.msra.gmra.mxu2 %v272_v15 }
 0x153   :  { %v291_v17 = vpop.f32.mrf.mxu2 }
 0x154   :  { %v292_v18 = vadd.f32 %v426_v16, %v291_v17 }
 0x156   :  { %295 = vst.msk [vmem:[#allocation5] sm:$0x3] %vm294_vm1, %v292_v18 }
 0x157   :  { %306 = dma.vmem_to_hbm [thread:$0]  %s302_s12, 32, %s304_s15, [#allocation4]  }
 0x158   :  { %477 = dma.done.wait [#allocation4], 32  }
 0x159   :  { %478 = vsyncadd [#allocation4], 4294967264 }
 0x15a   :  { %311 = vsyncpa [#allocation3], 1 }
 0x15b   :  { %312 = vsyncpa [#allocation4], 1 }

</bundles_post_ra>
